<compile_context>
chip_gen: v7x
topology: tpu7x:2x2x1
jax: 0.10.0
libtpu: 0.0.40
codegen_flags: <defaults>
</compile_context>

<pallas_src>
import jax
import jax.numpy as jnp
from jax.experimental import pallas as pl
from jax.experimental.pallas import tpu as pltpu

# Row offsets inside the packed (P_ROWS, 1) parameter column.
_W1_LO, _W1_HI = 0, 128      # layer-1 weight column (128,)
_B1_LO, _B1_HI = 128, 256    # layer-1 bias          (128,)
_B2_LO, _B2_HI = 256, 320    # layer-2 bias          (64,)
_W3_LO, _W3_HI = 320, 384    # layer-3 weight        (64,)
_B3_LO, _B3_HI = 384, 385    # layer-3 bias          (1,)
_P_ROWS = 392                # next multiple of 8 >= 385 (was 512)

_CHUNK = 128                 # in-kernel lane chunk (keeps working set ~24 vregs)
_LANE_GRANULE = 128          # batch tile granularity
_TB_CAP = 16384              # per-grid-step batch tile cap (VMEM ~128*TB bytes)


def _round_up(n, m):
    return ((n + m - 1) // m) * m


def _choose_tiling(batch):
    """Pick (TB, B_pad): big lane tiles, grid kept even (>=2) for v7x's 2 TCs."""
    bg = _round_up(max(batch, 1), _LANE_GRANULE)
    if bg < 2 * _LANE_GRANULE:
        return bg, bg                               # single step; can't split
    n_steps = max(2, -(-bg // _TB_CAP))             # at least 2 steps
    n_steps += n_steps % 2                          # keep the grid even
    tb = _round_up(-(-bg // n_steps), _LANE_GRANULE)
    return tb, n_steps * tb


def mlp_kernel(x_ref, w2_ref, p_ref, o_ref):
    # Thin params, loaded once per grid step (hoisted out of the chunk loop).
    w1 = p_ref[_W1_LO:_W1_HI, :]                # (128, 1)
    b1 = p_ref[_B1_LO:_B1_HI, :]                # (128, 1)
    b2 = p_ref[_B2_LO:_B2_HI, :]                # (64, 1)
    w3 = p_ref[_W3_LO:_W3_HI, :]                # (64, 1)
    b3 = p_ref[_B3_LO:_B3_HI, :]                # (1, 1)
    w2 = w2_ref[...]                            # (64, 128)

    n_chunks = x_ref.shape[1] // _CHUNK

    def chunk_body(c, carry):
        j = pl.multiple_of(c * _CHUNK, _CHUNK)
        x = x_ref[:, pl.ds(j, _CHUNK)]          # (1, C)  batch on lanes

        # Layer 1: in_features == 1 -> VPU broadcast multiply, skip the MXU.
        h1 = jnp.maximum(w1 * x + b1, 0.0)      # (128, C)

        # Layer 2: (64,128) @ (128,C) on the MXU with f32 accumulation.
        h2 = jnp.dot(w2, h1, preferred_element_type=jnp.float32) + b2
        h2 = jnp.maximum(h2, 0.0)               # (64, C)

        # Layer 3: out_features == 1 -> VPU multiply + sublane reduce (XLU),
        # producing a lane-dense (1, C) result.
        z = jnp.sum(h2 * w3, axis=0, keepdims=True) + b3
        o_ref[:, pl.ds(j, _CHUNK)] = jax.nn.sigmoid(z)
        return carry

    jax.lax.fori_loop(0, n_chunks, chunk_body, 0, unroll=min(8, n_chunks))


def prepare_params(params):
    """One-time packing (hoisted out of the per-call path)."""
    w1, b1, w2, b2, w3, b3 = params
    p = jnp.concatenate([
        w1.reshape(-1).astype(jnp.float32),     # rows   0:128
        b1.reshape(-1).astype(jnp.float32),     # rows 128:256
        b2.reshape(-1).astype(jnp.float32),     # rows 256:320
        w3.reshape(-1).astype(jnp.float32),     # rows 320:384
        b3.reshape(-1).astype(jnp.float32),     # row  384
    ])
    p = jnp.pad(p, (0, _P_ROWS - p.shape[0])).reshape(_P_ROWS, 1)
    return w2.astype(jnp.float32), p


@jax.jit
def net_forward(x, w2, p):
    """x: (B, 1) float32; w2, p from prepare_params. Returns (B, 1)."""
    B = x.shape[0]
    TB, B_pad = _choose_tiling(B)

    # Batch-on-lanes: (B, 1) -> (1, B), pad batch up to the tile multiple.
    xt = x.astype(jnp.float32).reshape(B, 1).T  # (1, B)
    if B_pad != B:
        xt = jnp.pad(xt, ((0, 0), (0, B_pad - B)))

    out_t = pl.pallas_call(
        mlp_kernel,
        out_shape=jax.ShapeDtypeStruct((1, B_pad), jnp.float32),
        grid=(B_pad // TB,),
        in_specs=[
            # x tile marches along the batch; default double-buffering hides
            # its (tiny) DMA at these tile sizes.
            pl.BlockSpec((1, TB), lambda i: (0, i)),
            # Weights: constant index_map -> fetched once, VMEM-resident.
            pl.BlockSpec((64, 128), lambda i: (0, 0)),
            pl.BlockSpec((_P_ROWS, 1), lambda i: (0, 0)),
        ],
        out_specs=pl.BlockSpec((1, TB), lambda i: (0, i)),
        compiler_params=pltpu.CompilerParams(
            dimension_semantics=("parallel",)),  # v7x: shard batch over 2 TCs
    )(xt, w2, p)

    return out_t[:, :B].T                        # back to (B, 1)


def init_params(key):
    # PyTorch nn.Linear layout: W is (out, in), b is (out,), uniform(+-1/sqrt(fan_in)).
    def linear(key, fan_in, fan_out):
        kw, kb = jax.random.split(key)
        bound = 1.0 / jnp.sqrt(jnp.float32(fan_in))
        w = jax.random.uniform(kw, (fan_out, fan_in), jnp.float32, -bound, bound)
        b = jax.random.uniform(kb, (fan_out,), jnp.float32, -bound, bound)
        return w, b

    k1, k2, k3 = jax.random.split(key, 3)
    w1, b1 = linear(k1, 1, 128)
    w2, b2 = linear(k2, 128, 64)
    w3, b3 = linear(k3, 64, 1)
    return (w1, b1, w2, b2, w3, b3)


def reference_forward(x, params):
    w1, b1, w2, b2, w3, b3 = params
    h1 = jnp.maximum(x @ w1.T + b1, 0.0)
    h2 = jnp.maximum(h1 @ w2.T + b2, 0.0)
    return jax.nn.sigmoid(h2 @ w3.T + b3)


if __name__ == "__main__":
    key = jax.random.PRNGKey(0)
    kx, kp = jax.random.split(key)
    params = init_params(kp)
    w2_packed, p_packed = prepare_params(params)   # one-time packing

    # B=8 (single padded tile) and B=1000 (even multi-step grid + batch padding).
    for B in (8, 1000):
        x = jax.random.normal(jax.random.fold_in(kx, B), (B, 1), jnp.float32)
        out = jax.block_until_ready(net_forward(x, w2_packed, p_packed))
        ref = reference_forward(x, params)
        assert out.shape == (B, 1)
        assert jnp.allclose(out, ref, atol=1e-5, rtol=1e-5), (
            f"B={B}: max abs err {jnp.max(jnp.abs(out - ref))}")

    print("KERNEL_OK")
</pallas_src>

<mosaic_0001>
module attributes {stable_mosaic.version = 11 : i64} {
  func.func @mlp_kernel(%arg0: i32, %arg1: memref<1x128xf32, #tpu.memory_space<vmem>>, %arg2: memref<64x128xf32, #tpu.memory_space<vmem>>, %arg3: memref<392x1xf32, #tpu.memory_space<vmem>>, %arg4: memref<1x128xf32, #tpu.memory_space<vmem>>) attributes {dimension_semantics = [#tpu.dimension_semantics<parallel>], iteration_bounds = array<i64: 1>, scalar_prefetch = 0 : i64, scratch_operands = 0 : i64, tpu.core_type = #tpu.core_type<tc>, window_params = [{transform_indices = @transform_0, window_bounds = array<i64: 1, 128>}, {pipeline_mode = #tpu.pipeline_mode<synchronous>, transform_indices = @transform_1, window_bounds = array<i64: 64, 128>}, {pipeline_mode = #tpu.pipeline_mode<synchronous>, transform_indices = @transform_2, window_bounds = array<i64: 392, 1>}, {transform_indices = @transform_3, window_bounds = array<i64: 1, 128>}]} {
    %c0 = arith.constant 0 : index
    %c0_0 = arith.constant 0 : index
    %0 = vector.load %arg3[%c0, %c0_0] : memref<392x1xf32, #tpu.memory_space<vmem>>, vector<128x1xf32>
    %c128 = arith.constant 128 : index
    %c0_1 = arith.constant 0 : index
    %1 = vector.load %arg3[%c128, %c0_1] : memref<392x1xf32, #tpu.memory_space<vmem>>, vector<128x1xf32>
    %c256 = arith.constant 256 : index
    %c0_2 = arith.constant 0 : index
    %2 = vector.load %arg3[%c256, %c0_2] : memref<392x1xf32, #tpu.memory_space<vmem>>, vector<64x1xf32>
    %c320 = arith.constant 320 : index
    %c0_3 = arith.constant 0 : index
    %3 = vector.load %arg3[%c320, %c0_3] : memref<392x1xf32, #tpu.memory_space<vmem>>, vector<64x1xf32>
    %c384 = arith.constant 384 : index
    %c0_4 = arith.constant 0 : index
    %4 = vector.load %arg3[%c384, %c0_4] : memref<392x1xf32, #tpu.memory_space<vmem>>, vector<1x1xf32>
    %c0_5 = arith.constant 0 : index
    %c0_6 = arith.constant 0 : index
    %5 = vector.load %arg2[%c0_5, %c0_6] : memref<64x128xf32, #tpu.memory_space<vmem>>, vector<64x128xf32>
    %c0_i32 = arith.constant 0 : i32
    %c128_i32 = arith.constant 128 : i32
    %6 = arith.muli %c0_i32, %c128_i32 : i32
    %7 = tpu.assume_multiple %6, 128 : i32
    %c0_7 = arith.constant 0 : index
    %8 = arith.index_cast %7 : i32 to index
    %9 = vector.load %arg1[%c0_7, %8] : memref<1x128xf32, #tpu.memory_space<vmem>>, vector<1x128xf32>
    %10 = vector.broadcast %0 : vector<128x1xf32> to vector<128x128xf32>
    %11 = vector.broadcast %9 : vector<1x128xf32> to vector<128x128xf32>
    %12 = arith.mulf %10, %11 : vector<128x128xf32>
    %13 = vector.broadcast %1 : vector<128x1xf32> to vector<128x128xf32>
    %14 = arith.addf %12, %13 : vector<128x128xf32>
    %cst = arith.constant 0.000000e+00 : f32
    %15 = vector.broadcast %cst : f32 to vector<128x128xf32>
    %16 = arith.maximumf %14, %15 : vector<128x128xf32>
    %cst_8 = arith.constant dense<0.000000e+00> : vector<64x128xf32>
    %17 = tpu.matmul %5, %16, %cst_8 {dimension_numbers = #tpu.dot_dimension_numbers<[1], [0], [0], [1], [0, 0, 1, 1], [], []>} : vector<64x128xf32>, vector<128x128xf32>, vector<64x128xf32> -> vector<64x128xf32>
    %18 = vector.broadcast %2 : vector<64x1xf32> to vector<64x128xf32>
    %19 = arith.addf %17, %18 : vector<64x128xf32>
    %cst_9 = arith.constant 0.000000e+00 : f32
    %20 = vector.broadcast %cst_9 : f32 to vector<64x128xf32>
    %21 = arith.maximumf %19, %20 : vector<64x128xf32>
    %22 = vector.broadcast %3 : vector<64x1xf32> to vector<64x128xf32>
    %23 = arith.mulf %21, %22 : vector<64x128xf32>
    %cst_10 = arith.constant dense<0.000000e+00> : vector<128xf32>
    %24 = vector.multi_reduction <add>, %23, %cst_10 [0] : vector<64x128xf32> to vector<128xf32>
    %25 = vector.shape_cast %24 : vector<128xf32> to vector<1x128xf32>
    %26 = vector.broadcast %4 : vector<1x1xf32> to vector<1x128xf32>
    %27 = arith.addf %25, %26 : vector<1x128xf32>
    %28 = arith.negf %27 : vector<1x128xf32>
    %29 = math.exp %28 : vector<1x128xf32>
    %cst_11 = arith.constant 1.000000e+00 : f32
    %30 = vector.broadcast %cst_11 : f32 to vector<1x128xf32>
    %31 = arith.addf %30, %29 : vector<1x128xf32>
    %32 = arith.divf %30, %31 : vector<1x128xf32>
    %c0_12 = arith.constant 0 : index
    %33 = arith.index_cast %7 : i32 to index
    %34 = vector.load %arg4[%c0_12, %33] : memref<1x128xf32, #tpu.memory_space<vmem>>, vector<1x128xf32>
    tpu.vector_store %arg4[%c0_12, %33], %32 {strides = array<i32>} : memref<1x128xf32, #tpu.memory_space<vmem>>, vector<1x128xf32>,
    %c1_i32 = arith.constant 1 : i32
    return
  }
  func.func @transform_0(%arg0: i32) -> (i32, i32) {
    %c0_i32 = arith.constant 0 : i32
    %c0_i32_0 = arith.constant 0 : i32
    return %c0_i32, %arg0 : i32, i32
  }
  func.func @transform_1(%arg0: i32) -> (i32, i32) {
    %c0_i32 = arith.constant 0 : i32
    %c0_i32_0 = arith.constant 0 : i32
    %c0_i32_1 = arith.constant 0 : i32
    return %c0_i32, %c0_i32_0 : i32, i32
  }
  func.func @transform_2(%arg0: i32) -> (i32, i32) {
    %c0_i32 = arith.constant 0 : i32
    %c0_i32_0 = arith.constant 0 : i32
    %c0_i32_1 = arith.constant 0 : i32
    return %c0_i32, %c0_i32_0 : i32, i32
  }
  func.func @transform_3(%arg0: i32) -> (i32, i32) {
    %c0_i32 = arith.constant 0 : i32
    %c0_i32_0 = arith.constant 0 : i32
    return %c0_i32, %arg0 : i32, i32
  }
}

</mosaic_0001>

<bundles_post_ra>
// kernel: net_forward.1
= control target key start
LH: loop header
LB: loop body
LE: loop exit
PB: predicated region body
PF: predicated region fallthrough
CT: control target
= control target key end

     0   :  { %v642_v0 = vmov 0   ;;  %s858_s2 = inlined_call_operand.vmem [shape: f32[392,1], index: 2, kind: input, shape index: {}]   ;;  %s859_s1 = inlined_call_operand.vmem [shape: f32[64,128], index: 1, kind: input, shape index: {}]   ;;  %s860_s0 = inlined_call_operand.vmem [shape: f32[1,128], index: 0, kind: input, shape index: {}]   ;;  %s861_s3 = inlined_call_operand.vmem [shape: f32[1,128], index: 3, kind: output, shape index: {}]  }
   0x1   :  { %637 = vset.pattern.permute.xlu1 %v642_v0  ;;  %636 = vset.pattern.permute.xlu0 %v642_v0  ;;  %v30_v1 = vld [vmem:[%s858_s2 + $0x80] sm:$0xff]  ;;  %v31_v3 = vld [vmem:[%s858_s2 + $0x88] sm:$0xff]  ;;  %v17_v5 = vld [vmem:[%s858_s2 + $0x18] sm:$0xff] }
   0x2   :  { %v14_v2 = vld [vmem:[%s858_s2] sm:$0xff]  ;;  %176 = vperm.xlu1 %637, %v30_v1   ;;  %v15_v4 = vld [vmem:[%s858_s2 + $0x8] sm:$0xff]  ;;  %v16_v6 = vld [vmem:[%s858_s2 + $0x10] sm:$0xff] }
   0x3   :  { %74 = vperm.xlu0 %636, %v14_v2   ;;  %v33_v7 = vld [vmem:[%s858_s2 + $0x98] sm:$0xff]  ;;  %v32_v8 = vld [vmem:[%s858_s2 + $0x90] sm:$0xff]  ;;  %v19_v9 = vld [vmem:[%s858_s2 + $0x28] sm:$0xff] }
   0x4   :  { %v18_v10 = vld [vmem:[%s858_s2 + $0x20] sm:$0xff]  ;;  %v35_v11 = vld [vmem:[%s858_s2 + $0xa8] sm:$0xff]  ;;  %v21_v13 = vld [vmem:[%s858_s2 + $0x38] sm:$0xff] }
   0x5   :  { %v34_v12 = vld [vmem:[%s858_s2 + $0xa0] sm:$0xff]  ;;  %v20_v14 = vld [vmem:[%s858_s2 + $0x30] sm:$0xff]  ;;  %v37_v15 = vld [vmem:[%s858_s2 + $0xb8] sm:$0xff] }
   0x6   :  { %181 = vperm.xlu1 %637, %v31_v3   ;;  %v36_v16 = vld [vmem:[%s858_s2 + $0xb0] sm:$0xff]  ;;  %v23_v17 = vld [vmem:[%s858_s2 + $0x48] sm:$0xff]  ;;  %v22_v18 = vld [vmem:[%s858_s2 + $0x40] sm:$0xff] }
   0x7   :  { %79 = vperm.xlu0 %636, %v15_v4   ;;  %v39_v19 = vld [vmem:[%s858_s2 + $0xc8] sm:$0xff]  ;;  %v38_v20 = vld [vmem:[%s858_s2 + $0xc0] sm:$0xff]  ;;  %v25_v21 = vld [vmem:[%s858_s2 + $0x58] sm:$0xff] }
   0x8   :  { %v24_v22 = vld [vmem:[%s858_s2 + $0x50] sm:$0xff]  ;;  %v41_v23 = vld [vmem:[%s858_s2 + $0xd8] sm:$0xff]  ;;  %v27_v25 = vld [vmem:[%s858_s2 + $0x68] sm:$0xff] }
   0x9   :  { %v40_v24 = vld [vmem:[%s858_s2 + $0xd0] sm:$0xff]  ;;  %v26_v26 = vld [vmem:[%s858_s2 + $0x60] sm:$0xff]  ;;  %v43_v27 = vld [vmem:[%s858_s2 + $0xe8] sm:$0xff] }
   0xa   :  { %89 = vperm.xlu1 %637, %v17_v5   ;;  %v42_v28 = vld [vmem:[%s858_s2 + $0xe0] sm:$0xff]  ;;  %v29_v29 = vld [vmem:[%s858_s2 + $0x78] sm:$0xff]  ;;  %v28_v30 = vld [vmem:[%s858_s2 + $0x70] sm:$0xff] }
   0xb   :  { %84 = vperm.xlu0 %636, %v16_v6   ;;  %v45_v31 = vld [vmem:[%s858_s2 + $0xf8] sm:$0xff]  ;;  %v44_v32 = vld [vmem:[%s858_s2 + $0xf0] sm:$0xff]  ;;  %v47_v33 = vld [vmem:[%s858_s2 + $0x108] sm:$0xff] }
   0xc   :  { %v46_v34 = vld [vmem:[%s858_s2 + $0x100] sm:$0xff]  ;;  %v49_v35 = vld [vmem:[%s858_s2 + $0x118] sm:$0xff]  ;;  %v48_v36 = vld [vmem:[%s858_s2 + $0x110] sm:$0xff] }
   0xd   :  { %v63_v37 = vld [vmem:[%s859_s1] sm:$0xff]  ;;  %v55_v39 = vld [vmem:[%s858_s2 + $0x148] sm:$0xff]  ;;  %v56_v41 = vld [vmem:[%s858_s2 + $0x150] sm:$0xff] }
   0xe   :  { %191 = vperm.xlu1 %637, %v33_v7   ;;  %v67_v38 = vld [vmem:[%s859_s1 + $0x20] sm:$0xff]  ;;  %575 = vmatprep.mubr.f32.mxu0 %v63_v37  ;;  %v57_v43 = vld [vmem:[%s858_s2 + $0x158] sm:$0xff]  ;;  %v51_v44 = vld [vmem:[%s858_s2 + $0x128] sm:$0xff] }
   0xf   :  { %186 = vperm.xlu0 %636, %v32_v8   ;;  %v54_v40 = vld [vmem:[%s858_s2 + $0x140] sm:$0xff]  ;;  %581 = vmatprep.mubr.f32.mxu1 %v67_v38  ;;  %v52_v46 = vld [vmem:[%s858_s2 + $0x130] sm:$0xff]  ;;  %v59_v47 = vld [vmem:[%s858_s2 + $0x168] sm:$0xff] }
  0x10   :  { %v50_v42 = vld [vmem:[%s858_s2 + $0x120] sm:$0xff]  ;;  %v53_v48 = vld [vmem:[%s858_s2 + $0x138] sm:$0xff]  ;;  %v60_v50 = vld [vmem:[%s858_s2 + $0x170] sm:$0xff] }
  0x11   :  { %v58_v45 = vld [vmem:[%s858_s2 + $0x160] sm:$0xff]  ;;  %v61_v49 = vld [vmem:[%s858_s2 + $0x178] sm:$0xff] }
  0x12   :  { %99 = vperm.xlu1 %637, %v19_v9   ;;  %v62_v51 = vld [vmem:[%s858_s2 + $0x180] sm:$0x1] }
  0x13   :  { %94 = vperm.xlu0 %636, %v18_v10   ;;  %v819_v52 = vld [vmem:[%s860_s0] ss:$0 sm:$0xff] }
  0x16   :  { %201 = vperm.xlu1 %637, %v35_v11  }
  0x17   :  { %196 = vperm.xlu0 %636, %v34_v12  }
  0x1a   :  { %109 = vperm.xlu1 %637, %v21_v13  }
  0x1b   :  { %104 = vperm.xlu0 %636, %v20_v14  }
  0x1e   :  { %211 = vperm.xlu1 %637, %v37_v15  }
  0x1f   :  { %206 = vperm.xlu0 %636, %v36_v16  }
  0x22   :  { %119 = vperm.xlu1 %637, %v23_v17  }
  0x23   :  { %114 = vperm.xlu0 %636, %v22_v18  }
  0x26   :  { %221 = vperm.xlu1 %637, %v39_v19  }
  0x27   :  { %216 = vperm.xlu0 %636, %v38_v20  }
  0x2a   :  { %129 = vperm.xlu1 %637, %v25_v21  }
  0x2b   :  { %124 = vperm.xlu0 %636, %v24_v22  }
  0x2e   :  { %231 = vperm.xlu1 %637, %v41_v23  }
  0x2f   :  { %226 = vperm.xlu0 %636, %v40_v24  }
  0x32   :  { %139 = vperm.xlu1 %637, %v27_v25  }
  0x33   :  { %134 = vperm.xlu0 %636, %v26_v26  }
  0x36   :  { %241 = vperm.xlu1 %637, %v43_v27  }
  0x37   :  { %236 = vperm.xlu0 %636, %v42_v28  }
  0x3a   :  { %149 = vperm.xlu1 %637, %v29_v29  }
  0x3b   :  { %144 = vperm.xlu0 %636, %v28_v30  }
  0x3e   :  { %251 = vperm.xlu1 %637, %v45_v31  }
  0x3f   :  { %246 = vperm.xlu0 %636, %v44_v32  }
  0x42   :  { %293 = vperm.xlu1 %637, %v47_v33  }
  0x43   :  { %288 = vperm.xlu0 %636, %v46_v34  }
  0x46   :  { %303 = vperm.xlu1 %637, %v49_v35  }
  0x47   :  { %298 = vperm.xlu0 %636, %v48_v36  }
  0x4a   :  { %446 = vperm.xlu1 %637, %v55_v39  }
  0x4b   :  { %441 = vperm.xlu0 %636, %v54_v40  }
  0x4e   :  { %451 = vperm.xlu1 %637, %v56_v41  }
  0x4f   :  { %308 = vperm.xlu0 %636, %v50_v42  }
  0x52   :  { %456 = vperm.xlu1 %637, %v57_v43  }
  0x53   :  { %313 = vperm.xlu0 %636, %v51_v44  }
  0x56   :  { %461 = vperm.xlu1 %637, %v58_v45  }
  0x57   :  { %318 = vperm.xlu0 %636, %v52_v46  }
  0x5a   :  { %466 = vperm.xlu1 %637, %v59_v47  }
  0x5b   :  { %323 = vperm.xlu0 %636, %v53_v48  }
  0x5e   :  { %476 = vperm.xlu1 %637, %v61_v49  }
  0x5f   :  { %471 = vperm.xlu0 %636, %v60_v50  }
  0x63   :  { %502 = vperm.xlu0 %636, %v62_v51  }
  0x81   :  { %v177_v53 = vpop.permute.xlu1 %176 }
  0x82   :  { %v75_v54 = vpop.permute.xlu0 %74 }
  0x83   :  { %v158_v55 = vmul.f32 %v819_v52, %v75_v54 }
  0x85   :  { %v182_v56 = vpop.permute.xlu1 %181  ;;  %v254_v58 = vadd.f32 %v177_v53, %v158_v55 }
  0x86   :  { %v80_v57 = vpop.permute.xlu0 %79 }
  0x87   :  { %v159_v59 = vmul.f32 %v819_v52, %v80_v57  ;;  %v270_v63 = vmax.f32 %v254_v58, 0.0 }
  0x89   :  { %v255_v60 = vadd.f32 %v182_v56, %v159_v59  ;;  %v90_v61 = vpop.permute.xlu1 %89 }
  0x8a   :  { %v85_v62 = vpop.permute.xlu0 %84  ;;  %v161_v2 = vmul.f32 %v819_v52, %v90_v61 }
  0x8b   :  { %v271_v0 = vmax.f32 %v255_v60, 0.0  ;;  %v160_v3 = vmul.f32 %v819_v52, %v85_v62 }
  0x8d   :  { %v587_v1 = vpack.c.bf16 %v271_v0, %v270_v63  ;;  %v192_v4 = vpop.permute.xlu1 %191 }
  0x8e   :  { %v187_v5 = vpop.permute.xlu0 %186  ;;  %v257_v6 = vadd.f32 %v192_v4, %v161_v2 }
  0x8f   :  { %v256_v7 = vadd.f32 %v187_v5, %v160_v3  ;;  %588 = vmatprep.subr.bf16.mxu0 %v587_v1  ;;  %619 = vmatprep.subr.bf16.mxu1 %v587_v1 }
  0x90   :  { %590 = vmatpush3.bf16.msra.mxu0 %v587_v1  ;;  %627 = vmatpush3.bf16.msra.mxu1 %v587_v1  ;;  %v273_v8 = vmax.f32 %v257_v6, 0.0 }
  0x91   :  { %v272_v9 = vmax.f32 %v256_v7, 0.0  ;;  %v100_v10 = vpop.permute.xlu1 %99 }
  0x92   :  { %v95_v11 = vpop.permute.xlu0 %94  ;;  %v163_v13 = vmul.f32 %v819_v52, %v100_v10 }
  0x93   :  { %v591_v12 = vpack.c.bf16 %v273_v8, %v272_v9  ;;  %v162_v14 = vmul.f32 %v819_v52, %v95_v11 }
  0x95   :  { %592 = vmatprep.subr.bf16.mxu0 %v591_v12  ;;  %620 = vmatprep.subr.bf16.mxu1 %v591_v12  ;;  %v202_v15 = vpop.permute.xlu1 %201 }
  0x96   :  { %v197_v16 = vpop.permute.xlu0 %196  ;;  %594 = vmatpush3.bf16.msra.mxu0 %v591_v12  ;;  %628 = vmatpush3.bf16.msra.mxu1 %v591_v12  ;;  %v259_v17 = vadd.f32 %v202_v15, %v163_v13  ;;  %v65_v15 = vld [vmem:[%s859_s1 + $0x10] sm:$0xff] }
  0x97   :  { %v258_v18 = vadd.f32 %v197_v16, %v162_v14  ;;  %v64_v14 = vld [vmem:[%s859_s1 + $0x8] sm:$0xff]  ;;  %v69_v16 = vld [vmem:[%s859_s1 + $0x30] sm:$0xff] }
  0x98   :  { %v275_v19 = vmax.f32 %v259_v17, 0.0  ;;  %v66_v17 = vld [vmem:[%s859_s1 + $0x18] sm:$0xff] }
  0x99   :  { %v274_v20 = vmax.f32 %v258_v18, 0.0  ;;  %v110_v21 = vpop.permute.xlu1 %109  ;;  %v70_v18 = vld [vmem:[%s859_s1 + $0x38] sm:$0xff] }
  0x9a   :  { %v105_v22 = vpop.permute.xlu0 %104  ;;  %v165_v24 = vmul.f32 %v819_v52, %v110_v21 }
  0x9b   :  { %v595_v23 = vpack.c.bf16 %v275_v19, %v274_v20  ;;  %v164_v25 = vmul.f32 %v819_v52, %v105_v22 }
  0x9d   :  { %596 = vmatprep.subr.bf16.mxu0 %v595_v23  ;;  %621 = vmatprep.subr.bf16.mxu1 %v595_v23  ;;  %v212_v26 = vpop.permute.xlu1 %211 }
  0x9e   :  { %v207_v27 = vpop.permute.xlu0 %206  ;;  %598 = vmatpush3.bf16.msra.mxu0 %v595_v23  ;;  %629 = vmatpush3.bf16.msra.mxu1 %v595_v23  ;;  %v261_v28 = vadd.f32 %v212_v26, %v165_v24 }
  0x9f   :  { %v260_v29 = vadd.f32 %v207_v27, %v164_v25 }
  0xa0   :  { %v277_v30 = vmax.f32 %v261_v28, 0.0 }
  0xa1   :  { %v276_v31 = vmax.f32 %v260_v29, 0.0  ;;  %v120_v32 = vpop.permute.xlu1 %119 }
  0xa2   :  { %v115_v33 = vpop.permute.xlu0 %114  ;;  %v167_v35 = vmul.f32 %v819_v52, %v120_v32 }
  0xa3   :  { %v599_v34 = vpack.c.bf16 %v277_v30, %v276_v31  ;;  %v166_v36 = vmul.f32 %v819_v52, %v115_v33 }
  0xa5   :  { %600 = vmatprep.subr.bf16.mxu0 %v599_v34  ;;  %622 = vmatprep.subr.bf16.mxu1 %v599_v34  ;;  %v222_v37 = vpop.permute.xlu1 %221 }
  0xa6   :  { %v217_v38 = vpop.permute.xlu0 %216  ;;  %602 = vmatpush3.bf16.msra.mxu0 %v599_v34  ;;  %630 = vmatpush3.bf16.msra.mxu1 %v599_v34  ;;  %v263_v39 = vadd.f32 %v222_v37, %v167_v35 }
  0xa7   :  { %v262_v40 = vadd.f32 %v217_v38, %v166_v36 }
  0xa8   :  { %v279_v41 = vmax.f32 %v263_v39, 0.0 }
  0xa9   :  { %v278_v42 = vmax.f32 %v262_v40, 0.0  ;;  %v130_v43 = vpop.permute.xlu1 %129 }
  0xaa   :  { %v125_v44 = vpop.permute.xlu0 %124  ;;  %v169_v46 = vmul.f32 %v819_v52, %v130_v43 }
  0xab   :  { %v603_v45 = vpack.c.bf16 %v279_v41, %v278_v42  ;;  %v168_v47 = vmul.f32 %v819_v52, %v125_v44 }
  0xad   :  { %604 = vmatprep.subr.bf16.mxu0 %v603_v45  ;;  %623 = vmatprep.subr.bf16.mxu1 %v603_v45  ;;  %v232_v48 = vpop.permute.xlu1 %231 }
  0xae   :  { %v227_v49 = vpop.permute.xlu0 %226  ;;  %606 = vmatpush3.bf16.msra.mxu0 %v603_v45  ;;  %631 = vmatpush3.bf16.msra.mxu1 %v603_v45  ;;  %v265_v50 = vadd.f32 %v232_v48, %v169_v46 }
  0xaf   :  { %v264_v51 = vadd.f32 %v227_v49, %v168_v47 }
  0xb0   :  { %v281_v53 = vmax.f32 %v265_v50, 0.0 }
  0xb1   :  { %v280_v54 = vmax.f32 %v264_v51, 0.0  ;;  %v140_v55 = vpop.permute.xlu1 %139 }
  0xb2   :  { %v135_v56 = vpop.permute.xlu0 %134  ;;  %v171_v58 = vmul.f32 %v819_v52, %v140_v55 }
  0xb3   :  { %v607_v57 = vpack.c.bf16 %v281_v53, %v280_v54  ;;  %v170_v59 = vmul.f32 %v819_v52, %v135_v56 }
  0xb5   :  { %608 = vmatprep.subr.bf16.mxu0 %v607_v57  ;;  %624 = vmatprep.subr.bf16.mxu1 %v607_v57  ;;  %v242_v60 = vpop.permute.xlu1 %241 }
  0xb6   :  { %v237_v61 = vpop.permute.xlu0 %236  ;;  %610 = vmatpush3.bf16.msra.mxu0 %v607_v57  ;;  %632 = vmatpush3.bf16.msra.mxu1 %v607_v57  ;;  %v267_v62 = vadd.f32 %v242_v60, %v171_v58 }
  0xb7   :  { %v266_v63 = vadd.f32 %v237_v61, %v170_v59 }
  0xb8   :  { %v283_v0 = vmax.f32 %v267_v62, 0.0 }
  0xb9   :  { %v282_v1 = vmax.f32 %v266_v63, 0.0  ;;  %v150_v2 = vpop.permute.xlu1 %149 }
  0xba   :  { %v145_v3 = vpop.permute.xlu0 %144  ;;  %v173_v5 = vmul.f32 %v819_v52, %v150_v2 }
  0xbb   :  { %v611_v4 = vpack.c.bf16 %v283_v0, %v282_v1  ;;  %v172_v6 = vmul.f32 %v819_v52, %v145_v3  ;;  %v68_v52 = vld [vmem:[%s859_s1 + $0x28] sm:$0xff] }
  0xbd   :  { %612 = vmatprep.subr.bf16.mxu0 %v611_v4  ;;  %625 = vmatprep.subr.bf16.mxu1 %v611_v4  ;;  %v252_v7 = vpop.permute.xlu1 %251 }
  0xbe   :  { %v247_v8 = vpop.permute.xlu0 %246  ;;  %614 = vmatpush3.bf16.msra.mxu0 %v611_v4  ;;  %633 = vmatpush3.bf16.msra.mxu1 %v611_v4  ;;  %v269_v9 = vadd.f32 %v252_v7, %v173_v5 }
  0xbf   :  { %v268_v10 = vadd.f32 %v247_v8, %v172_v6 }
  0xc0   :  { %v285_v11 = vmax.f32 %v269_v9, 0.0 }
  0xc1   :  { %v284_v12 = vmax.f32 %v268_v10, 0.0  ;;  %v294_v20 = vpop.permute.xlu1 %293 }
  0xc2   :  { %v289_v19 = vpop.permute.xlu0 %288 }
  0xc3   :  { %v615_v13 = vpack.c.bf16 %v285_v11, %v284_v12 }
  0xc5   :  { %616 = vmatprep.subr.bf16.mxu0 %v615_v13  ;;  %626 = vmatprep.subr.bf16.mxu1 %v615_v13  ;;  %v304_v22 = vpop.permute.xlu1 %303 }
  0xc6   :  { %618 = vmatpush3.bf16.msra.mxu0 %v615_v13  ;;  %634 = vmatpush3.bf16.msra.mxu1 %v615_v13  ;;  %v299_v21 = vpop.permute.xlu0 %298 }
  0xc9   :  { %576 = vmatmul.mubr.f32.vlgmr.msra.gmra.mrb[0].mxu0 %v64_v14  ;;  %582 = vmatmul.mubr.f32.vlgmr.msra.gmra.mrb[0].mxu1 %v68_v52  ;;  %v447_v24 = vpop.permute.xlu1 %446 }
  0xca   :  { %578 = vmatprep.mubr.f32.mxu0 %v65_v15  ;;  %584 = vmatprep.mubr.f32.mxu1 %v69_v16  ;;  %v442_v23 = vpop.permute.xlu0 %441 }
  0xcd   :  { %579 = vmatmul.mubr.f32.gmra.mrb[2].mxu0 %v66_v17  ;;  %585 = vmatmul.mubr.f32.gmra.mrb[2].mxu1 %v70_v18  ;;  %v452_v26 = vpop.permute.xlu1 %451 }
  0xce   :  { %v309_v25 = vpop.permute.xlu0 %308 }
  0xd1   :  { %v457_v28 = vpop.permute.xlu1 %456 }
  0xd2   :  { %v314_v27 = vpop.permute.xlu0 %313 }
  0xd5   :  { %v462_v47 = vpop.permute.xlu1 %461 }
  0xd6   :  { %v319_v35 = vpop.permute.xlu0 %318 }
  0xd9   :  { %v467_v61 = vpop.permute.xlu1 %466 }
  0xda   :  { %v324_v56 = vpop.permute.xlu0 %323 }
  0xdd   :  { %v477_v7 = vpop.permute.xlu1 %476 }
  0xde   :  { %v472_v4 = vpop.permute.xlu0 %471 }
  0xe2   :  { %v503_v16 = vpop.permute.xlu0 %502 }
 0x19c   :  { %v577_v29 = vpop.f32.mrb[0].mxu0  ;;  %v583_v30 = vpop.f32.mrb[0].mxu1 }
 0x19d   :  { %v398_v31 = vadd.f32 %v577_v29, %v294_v20  ;;  %v392_v32 = vpop.f32.mrb[1].mxu0  ;;  %v412_v33 = vpop.f32.mrb[1].mxu1  ;;  %v418_v48 = vadd.f32 %v583_v30, %v314_v27 }
 0x19e   :  { %v393_v34 = vadd.f32 %v392_v32, %v289_v19  ;;  %v413_v45 = vadd.f32 %v412_v33, %v309_v25 }
 0x19f   :  { %v432_v36 = vmax.f32 %v398_v31, 0.0  ;;  %v436_v57 = vmax.f32 %v418_v48, 0.0 }
 0x1a0   :  { %v431_v37 = vmax.f32 %v393_v34, 0.0  ;;  %v580_v38 = vpop.f32.mrb[2].mxu0  ;;  %v586_v39 = vpop.f32.mrb[2].mxu1  ;;  %v435_v53 = vmax.f32 %v413_v45, 0.0 }
 0x1a1   :  { %v480_v40 = vmul.f32 %v447_v24, %v432_v36  ;;  %v408_v41 = vadd.f32 %v580_v38, %v304_v22  ;;  %v402_v42 = vpop.f32.mrb[3].mxu0  ;;  %v422_v43 = vpop.f32.mrb[3].mxu1  ;;  %v428_v59 = vadd.f32 %v586_v39, %v324_v56  ;;  %v484_v1 = vmul.f32 %v467_v61, %v436_v57 }
 0x1a2   :  { %v479_v44 = vmul.f32 %v442_v23, %v431_v37  ;;  %v403_v46 = vadd.f32 %v402_v42, %v299_v21  ;;  %v423_v55 = vadd.f32 %v422_v43, %v319_v35  ;;  %v483_v62 = vmul.f32 %v462_v47, %v435_v53 }
 0x1a3   :  { %v434_v50 = vmax.f32 %v408_v41, 0.0  ;;  %v438_v2 = vmax.f32 %v428_v59, 0.0 }
 0x1a4   :  { %v487_v49 = vadd.f32 %v480_v40, %v479_v44  ;;  %v433_v51 = vmax.f32 %v403_v46, 0.0  ;;  %v437_v0 = vmax.f32 %v423_v55, 0.0 }
 0x1a5   :  { %v482_v58 = vmul.f32 %v457_v28, %v434_v50  ;;  %v486_v8 = vmul.f32 %v477_v7, %v438_v2 }
 0x1a6   :  { %v481_v54 = vmul.f32 %v452_v26, %v433_v51  ;;  %v485_v5 = vmul.f32 %v472_v4, %v437_v0 }
 0x1a8   :  { %v488_v60 = vadd.f32 %v487_v49, %v481_v54 }
 0x1aa   :  { %v489_v63 = vadd.f32 %v488_v60, %v482_v58 }
 0x1ac   :  { %v490_v3 = vadd.f32 %v489_v63, %v483_v62 }
 0x1ae   :  { %v491_v6 = vadd.f32 %v490_v3, %v484_v1 }
 0x1b0   :  { %v492_v9 = vadd.f32 %v491_v6, %v485_v5 }
 0x1b2   :  { %v493_v10 = vadd.f32 %v492_v9, %v486_v8 }
 0x1b4   :  { %v494_v11 = vrot.slane %v493_v10, 4 }
 0x1b6   :  { %v495_v12 = vadd.f32 %v494_v11, %v493_v10 }
 0x1b8   :  { %v496_v13 = vrot.slane %v495_v12, 2 }
 0x1ba   :  { %v497_v14 = vadd.f32 %v496_v13, %v495_v12 }
 0x1bc   :  { %v498_v52 = vrot.slane %v497_v14, 1 }
 0x1be   :  { %v499_v15 = vadd.f32 %v498_v52, %v497_v14 }
 0x1c0   :  { %v505_v17 = vadd.f32 %v503_v16, %v499_v15 }
 0x1c2   :  { %v518_v18 = vmul.f32 -1.442695, %v505_v17 }
 0x1c4   :  { %638 = vpow2.f32 %v518_v18 }
 0x1ce   :  { %v639_v19 = vpop.eup %638 }
 0x1cf   :  { %v509_v20 = vadd.f32 1.0, %v639_v19 }
 0x1d1   :  { %640 = vrcp.f32 %v509_v20 }
 0x1db   :  { %v641_v21 = vpop.eup %640 }
 0x1dc   :  { %512 = vst [vmem:[%s861_s3] sm:$0x1] %v641_v21 }

</bundles_post_ra>
